<compile_context>
chip_gen: v7x
topology: tpu7x:2x2x1
jax: 0.10.0
libtpu: 0.0.40
codegen_flags: <defaults>
</compile_context>

<pallas_src>
import jax
import jax.numpy as jnp
from jax.experimental import pallas as pl
from jax.experimental.pallas import tpu as pltpu

NEG_SLOPE = 0.01   # F.leaky_relu default negative slope
LANE = 128         # TPU vreg lane width


def _leaky_relu(x):
    return jnp.where(x >= 0, x, NEG_SLOPE * x)


def _cdiv(a, b):
    return -(-a // b)


def _round_up(v, m):
    return ((v + m - 1) // m) * m


# ---------------------------------------------------------------------------
# Kernel: transposed (feature-major) chain, batch on the lane dimension.
#   x block  : (TB, F) f32  -> cast to bf16, transpose fused into the matmul
#   h1, h2   : (H, TB) f32  -> lane-dense bias add + leaky_relu
#   out block: (A, TB) f32  -> fully lane-dense store
# Weights stay in PyTorch [out, in] orientation; biases are columns [out, 1].
# ---------------------------------------------------------------------------
def mlp_kernel(x_ref, w1_ref, b1_ref, w2_ref, b2_ref, w3_ref, b3_ref, o_ref):
    x = x_ref[...].astype(jnp.bfloat16)                           # (TB, F)

    # h1^T = W1 @ x^T   (MXU, f32 accumulation)
    h1 = jnp.dot(w1_ref[...], x.T,
                 preferred_element_type=jnp.float32) + b1_ref[...]
    h1 = _leaky_relu(h1)                                          # dropout1 -> identity

    h2 = jnp.dot(w2_ref[...], h1.astype(jnp.bfloat16),
                 preferred_element_type=jnp.float32) + b2_ref[...]
    h2 = _leaky_relu(h2)                                          # dropout2 -> identity

    out = jnp.dot(w3_ref[...], h2.astype(jnp.bfloat16),
                  preferred_element_type=jnp.float32) + b3_ref[...]
    o_ref[...] = out.astype(o_ref.dtype)                          # (A, TB), lane-dense


# ---------------------------------------------------------------------------
# Parameter prep (one-time, outside the hot path).
# ---------------------------------------------------------------------------
def prepare_params(raw):
    """PyTorch-style raw params (weight [out,in] f32, bias [out] f32) ->
    kernel layout: bf16 weights, f32 column biases."""
    return {
        "w1": raw["w1"].astype(jnp.bfloat16),
        "w2": raw["w2"].astype(jnp.bfloat16),
        "w3": raw["w3"].astype(jnp.bfloat16),
        "b1": raw["b1"].reshape(-1, 1).astype(jnp.float32),
        "b2": raw["b2"].reshape(-1, 1).astype(jnp.float32),
        "b3": raw["b3"].reshape(-1, 1).astype(jnp.float32),
    }


def _select_batch_tile(B, batch_tile):
    """Pick the batch tile (the lane dim of every block)."""
    if B <= LANE:
        return B, 1                                   # single full-extent block
    tb = min(batch_tile, _round_up(B, LANE))
    # >= 2 grid steps so ("parallel",) shards the batch over both v7x TCs.
    tb = min(tb, _round_up(_cdiv(B, 2), LANE))
    tb = max(tb, LANE)
    n = _cdiv(B, tb)
    if n > 1 and n % 2 == 1:                          # prefer an even step count
        tb2 = max(LANE, _round_up(_cdiv(B, n + 1), LANE))
        tb, n = tb2, _cdiv(B, tb2)
    return tb, n


def _jax_forward(x, params):
    """Plain-JAX small-batch path (same bf16-matmul / f32-epilogue recipe)."""
    bf = jnp.bfloat16
    h1 = _leaky_relu(jnp.dot(x.astype(bf), params["w1"].T,
                             preferred_element_type=jnp.float32) + params["b1"].T)
    h2 = _leaky_relu(jnp.dot(h1.astype(bf), params["w2"].T,
                             preferred_element_type=jnp.float32) + params["b2"].T)
    return (jnp.dot(h2.astype(bf), params["w3"].T,
                    preferred_element_type=jnp.float32) + params["b3"].T)


def net_forward(x, params, *, batch_tile=4096, min_pallas_batch=256,
                force_pallas=False):
    """x: [B, feature_numbers] f32 -> [B, action_numbers] f32 (eval mode)."""
    B, F = x.shape
    H = params["w1"].shape[0]
    A = params["w3"].shape[0]
    assert batch_tile % LANE == 0, "batch_tile must be a multiple of 128"

    # Tiny batches (per-step action selection): XLA fusion beats a kernel launch.
    if B < min_pallas_batch and not force_pallas:
        return _jax_forward(x, params)

    TB, n_steps = _select_batch_tile(B, batch_tile)
    Bp = TB * n_steps   # output padded to whole tiles; x itself is NOT padded.

    flops = 2 * B * (F * H + H * H + H * A)
    bytes_accessed = (B * F * 4                           # x (f32, read once)
                      + (F * H + H * H + H * A) * 2       # bf16 weights
                      + (2 * H + A) * 4                    # f32 biases
                      + A * Bp * 4)                        # out^T (f32)

    out_t = pl.pallas_call(
        mlp_kernel,
        out_shape=jax.ShapeDtypeStruct((A, Bp), jnp.float32),
        grid=(n_steps,),
        in_specs=[
            pl.BlockSpec((TB, F), lambda i: (i, 0)),       # activations: tiled rows
            pl.BlockSpec((H, F), lambda i: (0, 0)),        # params: resident
            pl.BlockSpec((H, 1), lambda i: (0, 0)),
            pl.BlockSpec((H, H), lambda i: (0, 0)),
            pl.BlockSpec((H, 1), lambda i: (0, 0)),
            pl.BlockSpec((A, H), lambda i: (0, 0)),
            pl.BlockSpec((A, 1), lambda i: (0, 0)),
        ],
        out_specs=pl.BlockSpec((A, TB), lambda i: (0, i)),  # batch on lanes
        compiler_params=pltpu.CompilerParams(
            dimension_semantics=("parallel",)),             # dual-TC on v7x
        cost_estimate=pl.CostEstimate(
            flops=flops, transcendentals=0, bytes_accessed=bytes_accessed),
    )(x, params["w1"], params["b1"], params["w2"], params["b2"],
      params["w3"], params["b3"])

    # Drop padded (garbage) batch columns, return batch-major [B, A].
    return out_t[:, :B].T


# ---------------------------------------------------------------------------
# PyTorch-matching init + references.
# ---------------------------------------------------------------------------
def init_params(key, feature_numbers, neuron_nums, action_numbers):
    """Weights [out,in] ~ N(0, 0.1) like .normal_(0, 0.1); biases [out] ~
    PyTorch Linear default U(-1/sqrt(fan_in), 1/sqrt(fan_in))."""
    k = jax.random.split(key, 6)

    def w(key_, fan_out, fan_in):
        return 0.1 * jax.random.normal(key_, (fan_out, fan_in), jnp.float32)

    def b(key_, fan_in, fan_out):
        bound = 1.0 / jnp.sqrt(jnp.float32(fan_in))
        return jax.random.uniform(key_, (fan_out,), jnp.float32, -bound, bound)

    return {
        "w1": w(k[0], neuron_nums, feature_numbers),
        "b1": b(k[1], feature_numbers, neuron_nums),
        "w2": w(k[2], neuron_nums, neuron_nums),
        "b2": b(k[3], neuron_nums, neuron_nums),
        "w3": w(k[4], action_numbers, neuron_nums),
        "b3": b(k[5], neuron_nums, action_numbers),
    }


def ref_forward_f32(x, raw):
    """Full-f32 reference (same math as the PyTorch eval-mode forward)."""
    h1 = _leaky_relu(x @ raw["w1"].T + raw["b1"])
    h2 = _leaky_relu(h1 @ raw["w2"].T + raw["b2"])
    return h2 @ raw["w3"].T + raw["b3"]


def ref_forward_bf16(x, raw):
    """Pure-JAX reference with the kernel's bf16-matmul / f32-accumulate recipe."""
    bf = jnp.bfloat16
    h1 = _leaky_relu(jnp.dot(x.astype(bf), raw["w1"].T.astype(bf),
                             preferred_element_type=jnp.float32) + raw["b1"])
    h2 = _leaky_relu(jnp.dot(h1.astype(bf), raw["w2"].T.astype(bf),
                             preferred_element_type=jnp.float32) + raw["b2"])
    return jnp.dot(h2.astype(bf), raw["w3"].T.astype(bf),
                   preferred_element_type=jnp.float32) + raw["b3"]


if __name__ == "__main__":
    feature_numbers = 16      # state feature dim
    neuron_nums = 32          # config['neuron_nums']
    action_numbers = 4        # discrete action count

    key = jax.random.PRNGKey(0)
    kx, kx2, kp = jax.random.split(key, 3)
    raw = init_params(kp, feature_numbers, neuron_nums, action_numbers)
    params = prepare_params(raw)

    # --- small batch: single-block path, forced through the Pallas kernel ----
    batch = 8
    x = jax.random.normal(kx, (batch, feature_numbers), jnp.float32)
    out = jax.block_until_ready(net_forward(x, params, force_pallas=True))
    assert out.shape == (batch, action_numbers)
    assert jnp.allclose(out, ref_forward_bf16(x, raw), atol=5e-3, rtol=5e-3)
    assert jnp.allclose(out, ref_forward_f32(x, raw), atol=5e-2, rtol=5e-2)

    # --- larger batch: 2-step lane-dense grid + ragged (unpadded) last tile --
    batch2 = 1200
    x2 = jax.random.normal(kx2, (batch2, feature_numbers), jnp.float32)
    out2 = jax.block_until_ready(net_forward(x2, params))
    assert out2.shape == (batch2, action_numbers)
    assert jnp.allclose(out2, ref_forward_bf16(x2, raw), atol=5e-3, rtol=5e-3)
    assert jnp.allclose(out2, ref_forward_f32(x2, raw), atol=5e-2, rtol=5e-2)

    print("KERNEL_OK")
</pallas_src>

<mosaic_0001>
module attributes {stable_mosaic.version = 11 : i64} {
  func.func @mlp_kernel(%arg0: i32, %arg1: memref<8x16xf32, #tpu.memory_space<vmem>>, %arg2: memref<32x16xbf16, #tpu.memory_space<vmem>>, %arg3: memref<32x1xf32, #tpu.memory_space<vmem>>, %arg4: memref<32x32xbf16, #tpu.memory_space<vmem>>, %arg5: memref<32x1xf32, #tpu.memory_space<vmem>>, %arg6: memref<4x32xbf16, #tpu.memory_space<vmem>>, %arg7: memref<4x1xf32, #tpu.memory_space<vmem>>, %arg8: memref<4x8xf32, #tpu.memory_space<vmem>>) attributes {dimension_semantics = [#tpu.dimension_semantics<parallel>], iteration_bounds = array<i64: 1>, scalar_prefetch = 0 : i64, scratch_operands = 0 : i64, tpu.core_type = #tpu.core_type<tc>, window_params = [{transform_indices = @transform_0, window_bounds = array<i64: 8, 16>}, {pipeline_mode = #tpu.pipeline_mode<synchronous>, transform_indices = @transform_1, window_bounds = array<i64: 32, 16>}, {pipeline_mode = #tpu.pipeline_mode<synchronous>, transform_indices = @transform_2, window_bounds = array<i64: 32, 1>}, {pipeline_mode = #tpu.pipeline_mode<synchronous>, transform_indices = @transform_3, window_bounds = array<i64: 32, 32>}, {pipeline_mode = #tpu.pipeline_mode<synchronous>, transform_indices = @transform_4, window_bounds = array<i64: 32, 1>}, {pipeline_mode = #tpu.pipeline_mode<synchronous>, transform_indices = @transform_5, window_bounds = array<i64: 4, 32>}, {pipeline_mode = #tpu.pipeline_mode<synchronous>, transform_indices = @transform_6, window_bounds = array<i64: 4, 1>}, {transform_indices = @transform_7, window_bounds = array<i64: 4, 8>}]} {
    %c0 = arith.constant 0 : index
    %c0_0 = arith.constant 0 : index
    %0 = vector.load %arg1[%c0, %c0_0] : memref<8x16xf32, #tpu.memory_space<vmem>>, vector<8x16xf32>
    %1 = arith.truncf %0 : vector<8x16xf32> to vector<8x16xbf16>
    %c0_1 = arith.constant 0 : index
    %c0_2 = arith.constant 0 : index
    %2 = vector.load %arg2[%c0_1, %c0_2] : memref<32x16xbf16, #tpu.memory_space<vmem>>, vector<32x16xbf16>
    %3 = tpu.transpose %1, [1, 0] : vector<8x16xbf16> -> vector<16x8xbf16>
    %cst = arith.constant dense<0.000000e+00> : vector<32x8xf32>
    %4 = tpu.matmul %2, %3, %cst {dimension_numbers = #tpu.dot_dimension_numbers<[1], [0], [0], [1], [0, 0, 1, 1], [], []>} : vector<32x16xbf16>, vector<16x8xbf16>, vector<32x8xf32> -> vector<32x8xf32>
    %c0_3 = arith.constant 0 : index
    %c0_4 = arith.constant 0 : index
    %5 = vector.load %arg3[%c0_3, %c0_4] : memref<32x1xf32, #tpu.memory_space<vmem>>, vector<32x1xf32>
    %6 = vector.broadcast %5 : vector<32x1xf32> to vector<32x8xf32>
    %7 = arith.addf %4, %6 : vector<32x8xf32>
    %cst_5 = arith.constant 0.000000e+00 : f32
    %8 = vector.broadcast %cst_5 : f32 to vector<32x8xf32>
    %9 = arith.cmpf oge, %7, %8 : vector<32x8xf32>
    %cst_6 = arith.constant 0.00999999977 : f32
    %10 = vector.broadcast %cst_6 : f32 to vector<32x8xf32>
    %11 = arith.mulf %10, %7 : vector<32x8xf32>
    %12 = arith.select %9, %7, %11 : vector<32x8xi1>, vector<32x8xf32>
    %c0_7 = arith.constant 0 : index
    %c0_8 = arith.constant 0 : index
    %13 = vector.load %arg4[%c0_7, %c0_8] : memref<32x32xbf16, #tpu.memory_space<vmem>>, vector<32x32xbf16>
    %14 = arith.truncf %12 : vector<32x8xf32> to vector<32x8xbf16>
    %cst_9 = arith.constant dense<0.000000e+00> : vector<32x8xf32>
    %15 = tpu.matmul %13, %14, %cst_9 {dimension_numbers = #tpu.dot_dimension_numbers<[1], [0], [0], [1], [0, 0, 1, 1], [], []>} : vector<32x32xbf16>, vector<32x8xbf16>, vector<32x8xf32> -> vector<32x8xf32>
    %c0_10 = arith.constant 0 : index
    %c0_11 = arith.constant 0 : index
    %16 = vector.load %arg5[%c0_10, %c0_11] : memref<32x1xf32, #tpu.memory_space<vmem>>, vector<32x1xf32>
    %17 = vector.broadcast %16 : vector<32x1xf32> to vector<32x8xf32>
    %18 = arith.addf %15, %17 : vector<32x8xf32>
    %cst_12 = arith.constant 0.000000e+00 : f32
    %19 = vector.broadcast %cst_12 : f32 to vector<32x8xf32>
    %20 = arith.cmpf oge, %18, %19 : vector<32x8xf32>
    %cst_13 = arith.constant 0.00999999977 : f32
    %21 = vector.broadcast %cst_13 : f32 to vector<32x8xf32>
    %22 = arith.mulf %21, %18 : vector<32x8xf32>
    %23 = arith.select %20, %18, %22 : vector<32x8xi1>, vector<32x8xf32>
    %c0_14 = arith.constant 0 : index
    %c0_15 = arith.constant 0 : index
    %24 = vector.load %arg6[%c0_14, %c0_15] : memref<4x32xbf16, #tpu.memory_space<vmem>>, vector<4x32xbf16>
    %25 = arith.truncf %23 : vector<32x8xf32> to vector<32x8xbf16>
    %cst_16 = arith.constant dense<0.000000e+00> : vector<4x8xf32>
    %26 = tpu.matmul %24, %25, %cst_16 {dimension_numbers = #tpu.dot_dimension_numbers<[1], [0], [0], [1], [0, 0, 1, 1], [], []>} : vector<4x32xbf16>, vector<32x8xbf16>, vector<4x8xf32> -> vector<4x8xf32>
    %c0_17 = arith.constant 0 : index
    %c0_18 = arith.constant 0 : index
    %27 = vector.load %arg7[%c0_17, %c0_18] : memref<4x1xf32, #tpu.memory_space<vmem>>, vector<4x1xf32>
    %28 = vector.broadcast %27 : vector<4x1xf32> to vector<4x8xf32>
    %29 = arith.addf %26, %28 : vector<4x8xf32>
    %c0_19 = arith.constant 0 : index
    %c0_20 = arith.constant 0 : index
    %30 = vector.load %arg8[%c0_19, %c0_20] : memref<4x8xf32, #tpu.memory_space<vmem>>, vector<4x8xf32>
    tpu.vector_store %arg8[%c0_19, %c0_20], %29 {strides = array<i32>} : memref<4x8xf32, #tpu.memory_space<vmem>>, vector<4x8xf32>,
    return
  }
  func.func @transform_0(%arg0: i32) -> (i32, i32) {
    %c0_i32 = arith.constant 0 : i32
    %c0_i32_0 = arith.constant 0 : i32
    return %arg0, %c0_i32 : i32, i32
  }
  func.func @transform_1(%arg0: i32) -> (i32, i32) {
    %c0_i32 = arith.constant 0 : i32
    %c0_i32_0 = arith.constant 0 : i32
    %c0_i32_1 = arith.constant 0 : i32
    return %c0_i32, %c0_i32_0 : i32, i32
  }
  func.func @transform_2(%arg0: i32) -> (i32, i32) {
    %c0_i32 = arith.constant 0 : i32
    %c0_i32_0 = arith.constant 0 : i32
    %c0_i32_1 = arith.constant 0 : i32
    return %c0_i32, %c0_i32_0 : i32, i32
  }
  func.func @transform_3(%arg0: i32) -> (i32, i32) {
    %c0_i32 = arith.constant 0 : i32
    %c0_i32_0 = arith.constant 0 : i32
    %c0_i32_1 = arith.constant 0 : i32
    return %c0_i32, %c0_i32_0 : i32, i32
  }
  func.func @transform_4(%arg0: i32) -> (i32, i32) {
    %c0_i32 = arith.constant 0 : i32
    %c0_i32_0 = arith.constant 0 : i32
    %c0_i32_1 = arith.constant 0 : i32
    return %c0_i32, %c0_i32_0 : i32, i32
  }
  func.func @transform_5(%arg0: i32) -> (i32, i32) {
    %c0_i32 = arith.constant 0 : i32
    %c0_i32_0 = arith.constant 0 : i32
    %c0_i32_1 = arith.constant 0 : i32
    return %c0_i32, %c0_i32_0 : i32, i32
  }
  func.func @transform_6(%arg0: i32) -> (i32, i32) {
    %c0_i32 = arith.constant 0 : i32
    %c0_i32_0 = arith.constant 0 : i32
    %c0_i32_1 = arith.constant 0 : i32
    return %c0_i32, %c0_i32_0 : i32, i32
  }
  func.func @transform_7(%arg0: i32) -> (i32, i32) {
    %c0_i32 = arith.constant 0 : i32
    %c0_i32_0 = arith.constant 0 : i32
    return %c0_i32, %arg0 : i32, i32
  }
}

</mosaic_0001>

<bundles_post_ra>
// kernel: tpu_custom_call.1
= control target key start
LH: loop header
LB: loop body
LE: loop exit
PB: predicated region body
PF: predicated region fallthrough
CT: control target
= control target key end

     0   :  { %vm68_vm0 = vcmask 130048   ;;  %v391_v3 = vmov 0   ;;  %s499_s0 = inlined_call_operand.vmem [shape: f32[8,16], index: 0, kind: input, shape index: {}]   ;;  %s500_s1 = inlined_call_operand.vmem [shape: bf16[32,16], index: 1, kind: input, shape index: {}]   ;;  %s501_s2 = inlined_call_operand.vmem [shape: f32[32,1], index: 2, kind: input, shape index: {}]   ;;  %s502_s3 = inlined_call_operand.vmem [shape: bf16[32,32], index: 3, kind: input, shape index: {}]   ;;  %s503_s4 = inlined_call_operand.vmem [shape: f32[32,1], index: 4, kind: input, shape index: {}]   ;;  %s504_s5 = inlined_call_operand.vmem [shape: bf16[4,32], index: 5, kind: input, shape index: {}]   ;;  %s505_s6 = inlined_call_operand.vmem [shape: f32[4,1], index: 6, kind: input, shape index: {}]   ;;  %s506_s7 = inlined_call_operand.hbm [shape: f32[4,8], index: 7, kind: output, shape index: {}]  }
   0x1   :  { %v28_v0 = vld [vmem:[%s499_s0] sm:$0xff]  ;;  %361 = vset.pattern.permute.xlu0 %v391_v3  ;;  %362 = vset.pattern.permute.xlu1 %v391_v3  ;;  %v36_v6 = vld [vmem:[%s501_s2 + $0x10] sm:$0xff]  ;;  %v35_v7 = vld [vmem:[%s501_s2 + $0x8] sm:$0xff] }
   0x2   :  { %v29_v1 = vpack.c.bf16 %v28_v0, %v28_v0  ;;  %v363_v2 = vld [vmem:[%s500_s1] sm:$0xff]   ;;  %50 = vperm.xlu1 %362, %v36_v6   ;;  %v37_v8 = vld [vmem:[%s501_s2 + $0x18] sm:$0xff] }
   0x3   :  { %v34_v4 = vld [vmem:[%s501_s2] sm:$0xff]  ;;  %336 = vmatprep.mubr.msk.bf16.mxu0 %vm68_vm0, %v363_v2 }
   0x4   :  { %356 = vmatprep.subr.msk.bf16.mxu0 %vm68_vm0, %v29_v1  ;;  %v76_v5 = vsel %vm68_vm0, %v29_v1, 0  ;;  %40 = vperm.xlu0 %361, %v34_v4  }
   0x5   :  { %335 = vmatpush3.bf16.xpose.msra.mxu0 %v76_v5 }
   0x6   :  { %12 = vsyncpa [#allocation3], 0  ;;  %v364_v9 = vld [vmem:[%s500_s1 + $0x8] sm:$0xff]   ;;  %v145_v10 = vld [vmem:[%s503_s4] sm:$0xff]  ;;  %55 = vperm.xlu1 %362, %v37_v8   ;;  %vm179_vm1 = vcmask 261120   ;;  %v392_v39 = vmov 0.0  }
   0x7   :  { %v146_v11 = vld [vmem:[%s503_s4 + $0x8] sm:$0xff]  ;;  %v147_v12 = vld [vmem:[%s503_s4 + $0x10] sm:$0xff]  ;;  %v148_v13 = vld [vmem:[%s503_s4 + $0x18] sm:$0xff]  ;;  %348 = vmatprep.subr.bf16.mxu0 %v392_v39  ;;  %vm393_vm6 = vmmov 0   ;;  %s394_s25 = smov [#allocation2]   ;;  %vm299_vm11 = vcmask 60416  }
   0x8   :  { %45 = vperm.xlu0 %361, %v35_v7   ;;  %v250_v14 = vld [vmem:[%s505_s6] sm:$0xf]  ;;  %v366_v38 = vld [vmem:[%s502_s3 + $0x8] sm:$0xff]   ;;  %s307_s26 = sshll.u32 %s394_s25, 4  ;;  %s308_s26 = int_to_ptr.vmem [resolvable:$true] %s307_s26 }
   0x9   :  { %v365_v15 = vld [vmem:[%s502_s3] sm:$0xff]   ;;  %s367_s27 = scalar_lea.vmem %s308_s26, 64  ;;  %p372_p1 = scmp.lt.s32.totalorder %s308_s26, %s308_s26 }
   0xa   :  { %156 = vperm.xlu1 %362, %v146_v11   ;;  %344 = vmatprep.mubr.msk.bf16.mxu1 %vm179_vm1, %v365_v15  ;;  %v247_v62 = vld [vmem:[%s504_s5] sm:$0x3]  ;;  %p368_p0 = scmp.ne.s32.totalorder %s308_s26, %s367_s27  ;;  %p373_p2 = scmp.lt.s32.totalorder %s367_s27, %s367_s27 }
   0xc   :  { %337 = vmatmul.mubr.msk.bf16.vlgmr.msra.gmra.mrb[0].mxu0 %vm68_vm0, %v364_v9  ;;  %151 = vperm.xlu0 %361, %v145_v10   ;;  %p374_p3 = por %p373_p2, %p372_p1 }
   0xd   :  { %352 = vmatprep.mubr.msk.bf16.mxu0 %vm393_vm6, %v392_v39 }
   0xe   :  { %166 = vperm.xlu1 %362, %v148_v13   ;;  %p375_p4 = pnand %p374_p3, %p368_p0 }
  0x10   :  { %161 = vperm.xlu0 %361, %v147_v12  }
  0x14   :  { %253 = vperm.xlu0 %361, %v250_v14  }
  0x81   :  { %v51_v16 = vpop.permute.xlu1 %50 }
  0x83   :  { %v41_v17 = vpop.permute.xlu0 %40 }
  0x85   :  { %v56_v21 = vpop.permute.xlu1 %55 }
  0x87   :  { %v46_v24 = vpop.permute.xlu0 %45 }
  0x89   :  { %v157_v41 = vpop.permute.xlu1 %156 }
  0x8b   :  { %v152_v40 = vpop.permute.xlu0 %151 }
  0x8d   :  { %v167_v46 = vpop.permute.xlu1 %166 }
  0x8f   :  { %v162_v42 = vpop.permute.xlu0 %161 }
  0x93   :  { %v254_v63 = vpop.permute.xlu0 %253 }
  0xdf   :  { %v338_v18 = vpop.f32.mrb[0].mxu0 }
  0xe0   :  { %v121_v19 = vadd.f32 %v338_v18, %v51_v16  ;;  %v112_v20 = vpop.f32.mrb[1].mxu0 }
  0xe1   :  { %v113_v22 = vadd.f32 %v112_v20, %v41_v17  ;;  %v339_v23 = vpop.f32.mrb[2].mxu0 }
  0xe2   :  { %v133_v25 = vmul.f32 0.01, %v121_v19  ;;  %v124_v26 = vadd.f32 %v339_v23, %v56_v21  ;;  %v115_v27 = vpop.f32.mrb[3].mxu0  ;;  %vm129_vm2 = vcmp.ge.f32.partialorder %v121_v19, 0.0 }
  0xe3   :  { %v131_v28 = vmul.f32 0.01, %v113_v22  ;;  %v116_v29 = vadd.f32 %v115_v27, %v46_v24  ;;  %vm127_vm4 = vcmp.ge.f32.partialorder %v113_v22, 0.0 }
  0xe4   :  { %vm130_vm3 = vcmp.ge.f32.partialorder %v124_v26, 0.0  ;;  %v134_v30 = vmul.f32 0.01, %v124_v26  ;;  %v137_v32 = vsel %vm129_vm2, %v121_v19, %v133_v25 }
  0xe5   :  { %v132_v31 = vmul.f32 0.01, %v116_v29  ;;  %vm128_vm5 = vcmp.ge.f32.partialorder %v116_v29, 0.0  ;;  %v135_v34 = vsel %vm127_vm4, %v113_v22, %v131_v28 }
  0xe6   :  { %v138_v33 = vsel %vm130_vm3, %v124_v26, %v134_v30 }
  0xe7   :  { %v136_v35 = vsel %vm128_vm5, %v116_v29, %v132_v31  ;;  %v144_v36 = vpack.c.bf16 %v138_v33, %v137_v32 }
  0xe8   :  { %v143_v37 = vpack.c.bf16 %v136_v35, %v135_v34 }
  0xea   :  { %340 = vmatprep.subr.bf16.mxu1 %v143_v37 }
  0xeb   :  { %341 = vmatpush3.bf16.msra.mxu1 %v143_v37 }
  0xec   :  { %342 = vmatprep.subr.bf16.mxu1 %v144_v36 }
  0xef   :  { %343 = vmatpush3.bf16.msra.mxu1 %v144_v36 }
  0xf2   :  { %345 = vmatmul.mubr.msk.bf16.vlgmr.msra.gmra.mrb[0].mxu1 %vm179_vm1, %v366_v38 }
 0x1c5   :  { %v346_v43 = vpop.f32.mrb[0].mxu1 }
 0x1c6   :  { %v229_v44 = vadd.f32 %v346_v43, %v162_v42  ;;  %v220_v45 = vpop.f32.mrb[1].mxu1 }
 0x1c7   :  { %v221_v47 = vadd.f32 %v220_v45, %v152_v40  ;;  %v347_v48 = vpop.f32.mrb[2].mxu1 }
 0x1c8   :  { %v241_v49 = vmul.f32 0.01, %v229_v44  ;;  %v232_v50 = vadd.f32 %v347_v48, %v167_v46  ;;  %v223_v51 = vpop.f32.mrb[3].mxu1  ;;  %vm237_vm7 = vcmp.ge.f32.partialorder %v229_v44, 0.0 }
 0x1c9   :  { %v239_v52 = vmul.f32 0.01, %v221_v47  ;;  %v224_v53 = vadd.f32 %v223_v51, %v157_v41  ;;  %vm235_vm8 = vcmp.ge.f32.partialorder %v221_v47, 0.0 }
 0x1ca   :  { %vm238_vm9 = vcmp.ge.f32.partialorder %v232_v50, 0.0  ;;  %v242_v54 = vmul.f32 0.01, %v232_v50  ;;  %v245_v56 = vsel %vm237_vm7, %v229_v44, %v241_v49 }
 0x1cb   :  { %vm236_vm10 = vcmp.ge.f32.partialorder %v224_v53, 0.0  ;;  %v240_v55 = vmul.f32 0.01, %v224_v53  ;;  %v243_v58 = vsel %vm235_vm8, %v221_v47, %v239_v52 }
 0x1cc   :  { %v246_v57 = vsel %vm238_vm9, %v232_v50, %v242_v54 }
 0x1cd   :  { %v249_v59 = vpack.c.bf16 %v246_v57, %v245_v56  ;;  %v244_v60 = vsel %vm236_vm10, %v224_v53, %v240_v55 }
 0x1ce   :  { %v248_v61 = vpack.c.bf16 %v244_v60, %v243_v58 }
 0x1d0   :  { %349 = vmatpush3.bf16.msra.mxu0 %v248_v61 }
 0x1d1   :  { %350 = vmatprep.subr.bf16.mxu0 %v392_v39 }
 0x1d4   :  { %351 = vmatpush3.bf16.msra.mxu0 %v249_v59 }
 0x1d7   :  { %353 = vmatmul.mubr.msk.bf16.vlgmr.msra.gmra.mrb[4].mxu0 %vm179_vm1, %v247_v62 }
 0x2aa   :  { %v293_v0 = vpop.f32.mrb[4].mxu0 }
 0x2ab   :  { %v294_v1 = vadd.f32 %v293_v0, %v254_v63  ;;  %v354_v2 = vpop.f32.mrb[5].mxu0 }
 0x2ac   :  { %v296_v3 = vpop.f32.mrb[6].mxu0 }
 0x2ad   :  { %v355_v4 = vpop.f32.mrb[7].mxu0  ;;  %300 = vst.msk [vmem:[#allocation2] sm:$0xf] %vm299_vm11, %v294_v1 }
 0x2ae   :  { %378 = shalt.err (!%p375_p4)
}
 0x2af   :  { %s379_s29 = scalar_lea.hbm %s506_s7, 64 }
 0x2b0   :  { %p380_p5 = scmp.ne.s32.totalorder %s506_s7, %s379_s29  ;;  %p383_p6 = scmp.lt.u32.totalorder %s379_s29, %s506_s7 }
 0x2b2   :  { %p385_p7 = pnand %p383_p6, %p380_p5 }
 0x2b4   :  { %388 = shalt.err (!%p385_p7)
}
 0x2b5   :  { %310 = dma.vmem_to_hbm [thread:$0]  %s308_s26, 64, %s506_s7, [#allocation3]  }
 0x2b6   :  { %389 = dma.done.wait [#allocation3], 64  }
 0x2b7   :  { %390 = vsyncadd [#allocation3], 4294967232 }
 0x2b8   :  { %314 = vsyncpa [#allocation3], 1 }

</bundles_post_ra>
